<compile_context>
chip_gen: v7x
topology: tpu7x:2x2x1
jax: 0.10.0
libtpu: 0.0.40
codegen_flags: <defaults>
</compile_context>

<pallas_src>
import functools

import jax
import jax.numpy as jnp
from jax import lax
from jax.experimental import pallas as pl
from jax.experimental.pallas import tpu as pltpu

EPS = 1e-5
LANE = 128
VMEM_LIMIT = 32 * 1024 * 1024  # safe on v5e/v6e/v7x; tiles here are far smaller


def _round_up(x, m):
    return (x + m - 1) // m * m


# --------------------------------------------------------------------------
# Pass 1: conv as matmul (bf16 operands, f32 accumulation) + per-tile partial
#          BN sums (sum, sum-of-squares) for the two-phase batch norm.
# --------------------------------------------------------------------------
def conv_stats_kernel(m_true, tm, p_ref, w_ref, b_ref, y_ref, stats_ref):
    # p_ref: (TM, Kp) bf16, w_ref: (Kp, Coutp) bf16 (resident), b_ref: (1, Coutp) f32
    y = jnp.dot(p_ref[...], w_ref[...], preferred_element_type=jnp.float32)
    y = y + b_ref[...]                                   # (TM, Coutp) f32
    y_ref[...] = y.astype(y_ref.dtype)                   # bf16 intermediate

    # Mask rows that are only padding of the M axis so they do not pollute the
    # batch statistics (padded patch rows would otherwise contribute `bias`).
    row = lax.broadcasted_iota(jnp.int32, (tm, 1), 0) + pl.program_id(0) * tm
    valid = row < m_true
    y_m = jnp.where(valid, y, 0.0)

    s = jnp.sum(y_m, axis=0, keepdims=True)              # (1, Coutp)
    ss = jnp.sum(y_m * y_m, axis=0, keepdims=True)       # (1, Coutp)
    pad = jnp.zeros((6, y.shape[1]), jnp.float32)
    stats_ref[...] = jnp.concatenate([s, ss, pad], axis=0)[None]   # (1, 8, Coutp)


# --------------------------------------------------------------------------
# Pass 2: per-channel affine normalization (folded BN) + ReLU, tiled over M.
# --------------------------------------------------------------------------
def bn_relu_kernel(y_ref, scale_ref, shift_ref, o_ref):
    y = y_ref[...].astype(jnp.float32)                   # (TM, Coutp)
    o_ref[...] = jnp.maximum(y * scale_ref[...] + shift_ref[...], 0.0)


# --------------------------------------------------------------------------
# im2col: (N, C, H, W) -> (N*H*W, C*kh*kw), column order (c, i, j) to match
# weight.reshape(Cout, Cin*kh*kw).
# --------------------------------------------------------------------------
def _im2col(x, kh, kw, pad):
    N, C, H, W = x.shape
    xp = jnp.pad(x, ((0, 0), (0, 0), (pad, pad), (pad, pad)))
    cols = [xp[:, :, i:i + H, j:j + W] for i in range(kh) for j in range(kw)]
    patches = jnp.stack(cols, axis=2)                    # (N, C, kh*kw, H, W)
    patches = patches.transpose(0, 3, 4, 1, 2)           # (N, H, W, C, kh*kw)
    return patches.reshape(N * H * W, C * kh * kw)


def vgg_conv_forward(x, weight, bias, gamma, beta, *, tm=256):
    """x: (N, Cin, H, W) NCHW; weight: (Cout, Cin, kh, kw). Returns NCHW f32."""
    N, Cin, H, W = x.shape
    Cout, _, kh, kw = weight.shape
    pad = (kh - 1) // 2            # 1 for the 3x3 path, 0 for use_one (1x1)

    patches = _im2col(x.astype(jnp.float32), kh, kw, pad)     # (M, K)
    M, K = patches.shape

    # Pad K and Cout to lane multiples (exact: zero columns / channels), and M
    # to a tile multiple (masked in the stats, sliced off at the end).
    Kp = _round_up(K, LANE)
    Coutp = _round_up(Cout, LANE)
    Mp = _round_up(M, tm)
    nM = Mp // tm

    patches = jnp.pad(patches, ((0, Mp - M), (0, Kp - K))).astype(jnp.bfloat16)
    w_mat = weight.reshape(Cout, Cin * kh * kw).T.astype(jnp.float32)   # (K, Cout)
    w_mat = jnp.pad(w_mat, ((0, Kp - K), (0, Coutp - Cout))).astype(jnp.bfloat16)
    b_row = jnp.pad(bias.astype(jnp.float32), (0, Coutp - Cout)).reshape(1, Coutp)

    compiler_params = pltpu.CompilerParams(
        dimension_semantics=("parallel",),          # megacore-friendly on v7x
        vmem_limit_bytes=VMEM_LIMIT)

    # ---- pass 1: matmul + partial statistics -------------------------------
    y, part = pl.pallas_call(
        functools.partial(conv_stats_kernel, M, tm),
        out_shape=(
            jax.ShapeDtypeStruct((Mp, Coutp), jnp.bfloat16),      # conv output
            jax.ShapeDtypeStruct((nM, 8, Coutp), jnp.float32),    # partial sums
        ),
        grid=(nM,),
        in_specs=[
            pl.BlockSpec((tm, Kp), lambda i: (i, 0)),             # patch tile
            pl.BlockSpec((Kp, Coutp), lambda i: (0, 0)),          # weights (resident)
            pl.BlockSpec((1, Coutp), lambda i: (0, 0)),           # bias (resident)
        ],
        out_specs=(
            pl.BlockSpec((tm, Coutp), lambda i: (i, 0)),
            pl.BlockSpec((1, 8, Coutp), lambda i: (i, 0, 0)),
        ),
        compiler_params=compiler_params,
    )(patches, w_mat, b_row)

    # ---- fold partial sums -> per-channel scale / shift (tiny, f32) --------
    ssum = jnp.sum(part[:, 0, :], axis=0)                 # (Coutp,)
    ssq = jnp.sum(part[:, 1, :], axis=0)                  # (Coutp,)
    mean = ssum / M
    var = jnp.maximum(ssq / M - mean * mean, 0.0)         # biased (training-mode) var
    inv = lax.rsqrt(var + EPS)
    g = jnp.pad(gamma.astype(jnp.float32), (0, Coutp - Cout))
    b = jnp.pad(beta.astype(jnp.float32), (0, Coutp - Cout))
    scale = (g * inv).reshape(1, Coutp)
    shift = (b - mean * g * inv).reshape(1, Coutp)

    # ---- pass 2: normalize + ReLU ------------------------------------------
    out = pl.pallas_call(
        bn_relu_kernel,
        out_shape=jax.ShapeDtypeStruct((Mp, Coutp), jnp.float32),
        grid=(nM,),
        in_specs=[
            pl.BlockSpec((tm, Coutp), lambda i: (i, 0)),
            pl.BlockSpec((1, Coutp), lambda i: (0, 0)),
            pl.BlockSpec((1, Coutp), lambda i: (0, 0)),
        ],
        out_specs=pl.BlockSpec((tm, Coutp), lambda i: (i, 0)),
        compiler_params=compiler_params,
    )(y, scale, shift)

    # (Mp, Coutp) -> (M, Cout) -> NHWC -> NCHW (keep NHWC if the consumer is
    # another channels-last Pallas kernel to skip this transpose).
    out = out[:M, :Cout].reshape(N, H, W, Cout)
    return out.transpose(0, 3, 1, 2)


# --------------------------------------------------------------------------
# Pure-JAX f32 reference (matches nn.Conv2d -> nn.BatchNorm2d(train) -> ReLU)
# --------------------------------------------------------------------------
def vgg_conv_reference(x, weight, bias, gamma, beta):
    y = lax.conv_general_dilated(
        x.astype(jnp.float32), weight.astype(jnp.float32),
        window_strides=(1, 1), padding=((1, 1), (1, 1)),
        dimension_numbers=("NCHW", "OIHW", "NCHW"))
    y = y + bias.reshape(1, -1, 1, 1)
    mean = jnp.mean(y, axis=(0, 2, 3), keepdims=True)
    var = jnp.mean((y - mean) ** 2, axis=(0, 2, 3), keepdims=True)
    y = (y - mean) * lax.rsqrt(var + EPS)
    y = y * gamma.reshape(1, -1, 1, 1) + beta.reshape(1, -1, 1, 1)
    return jnp.maximum(y, 0.0)


if __name__ == "__main__":
    # Small shapes consistent with the module: batch=2, in_channel=4,
    # out_channel=8, spatial=16x16, filter_size=3 (use_one=False).
    N, Cin, Cout, H, W = 2, 4, 8, 16, 16
    key = jax.random.PRNGKey(0)
    k_x, k_w, k_b = jax.random.split(key, 3)

    x = jax.random.normal(k_x, (N, Cin, H, W), dtype=jnp.float32)
    fan_in = Cin * 3 * 3
    bound = 1.0 / (fan_in ** 0.5)
    weight = jax.random.uniform(k_w, (Cout, Cin, 3, 3), jnp.float32, -bound, bound)
    bias = jax.random.uniform(k_b, (Cout,), jnp.float32, -bound, bound)
    gamma = jnp.ones((Cout,), jnp.float32)   # BatchNorm2d default weight
    beta = jnp.zeros((Cout,), jnp.float32)   # BatchNorm2d default bias

    out = jax.block_until_ready(vgg_conv_forward(x, weight, bias, gamma, beta))
    ref = jax.block_until_ready(vgg_conv_reference(x, weight, bias, gamma, beta))

    assert out.shape == (N, Cout, H, W)
    # bf16 MXU operands + bf16 intermediate -> loosened tolerance vs f32 ref.
    assert jnp.allclose(out, ref, rtol=5e-2, atol=5e-2), (
        "mismatch vs reference, max abs diff = "
        f"{float(jnp.max(jnp.abs(out - ref)))}")
    print("KERNEL_OK")
</pallas_src>

<mosaic_0001>
module attributes {stable_mosaic.version = 11 : i64} {
  func.func @conv_stats_kernel(%arg0: i32, %arg1: memref<256x128xbf16, #tpu.memory_space<vmem>>, %arg2: memref<128x128xbf16, #tpu.memory_space<vmem>>, %arg3: memref<1x128xf32, #tpu.memory_space<vmem>>, %arg4: memref<256x128xbf16, #tpu.memory_space<vmem>>, %arg5: memref<1x8x128xf32, #tpu.memory_space<vmem>>) attributes {dimension_semantics = [#tpu.dimension_semantics<parallel>], iteration_bounds = array<i64: 2>, scalar_prefetch = 0 : i64, scratch_operands = 0 : i64, tpu.core_type = #tpu.core_type<tc>, window_params = [{transform_indices = @transform_0, window_bounds = array<i64: 256, 128>}, {pipeline_mode = #tpu.pipeline_mode<synchronous>, transform_indices = @transform_1, window_bounds = array<i64: 128, 128>}, {pipeline_mode = #tpu.pipeline_mode<synchronous>, transform_indices = @transform_2, window_bounds = array<i64: 1, 128>}, {transform_indices = @transform_3, window_bounds = array<i64: 256, 128>}, {transform_indices = @transform_4, window_bounds = array<i64: 1, 8, 128>}]} {
    %c0 = arith.constant 0 : index
    %c0_0 = arith.constant 0 : index
    %0 = vector.load %arg1[%c0, %c0_0] : memref<256x128xbf16, #tpu.memory_space<vmem>>, vector<256x128xbf16>
    %c0_1 = arith.constant 0 : index
    %c0_2 = arith.constant 0 : index
    %1 = vector.load %arg2[%c0_1, %c0_2] : memref<128x128xbf16, #tpu.memory_space<vmem>>, vector<128x128xbf16>
    %cst = arith.constant dense<0.000000e+00> : vector<256x128xf32>
    %2 = tpu.matmul %0, %1, %cst {dimension_numbers = #tpu.dot_dimension_numbers<[1], [0], [0], [1], [0, 0, 1, 1], [], []>} : vector<256x128xbf16>, vector<128x128xbf16>, vector<256x128xf32> -> vector<256x128xf32>
    %c0_3 = arith.constant 0 : index
    %c0_4 = arith.constant 0 : index
    %3 = vector.load %arg3[%c0_3, %c0_4] : memref<1x128xf32, #tpu.memory_space<vmem>>, vector<1x128xf32>
    %4 = vector.broadcast %3 : vector<1x128xf32> to vector<256x128xf32>
    %5 = arith.addf %2, %4 : vector<256x128xf32>
    %6 = arith.truncf %5 : vector<256x128xf32> to vector<256x128xbf16>
    %c0_5 = arith.constant 0 : index
    %c0_6 = arith.constant 0 : index
    %7 = vector.load %arg4[%c0_5, %c0_6] : memref<256x128xbf16, #tpu.memory_space<vmem>>, vector<256x128xbf16>
    tpu.vector_store %arg4[%c0_5, %c0_6], %6 {strides = array<i32>} : memref<256x128xbf16, #tpu.memory_space<vmem>>, vector<256x128xbf16>,
    %8 = tpu.iota {dimensions = array<i32: 0>} : vector<256x1xi32>
    %c256_i32 = arith.constant 256 : i32
    %9 = arith.muli %arg0, %c256_i32 : i32
    %10 = vector.broadcast %9 : i32 to vector<256x1xi32>
    %11 = arith.addi %8, %10 : vector<256x1xi32>
    %c512_i32 = arith.constant 512 : i32
    %12 = vector.broadcast %c512_i32 : i32 to vector<256x1xi32>
    %13 = arith.cmpi slt, %11, %12 : vector<256x1xi32>
    %cst_7 = arith.constant 0.000000e+00 : f32
    %14 = vector.shape_cast %13 : vector<256x1xi1> to vector<256x1xi1>
    %15 = vector.broadcast %14 : vector<256x1xi1> to vector<256x128xi1>
    %16 = vector.broadcast %cst_7 : f32 to vector<256x128xf32>
    %17 = arith.select %15, %5, %16 : vector<256x128xi1>, vector<256x128xf32>
    %cst_8 = arith.constant dense<0.000000e+00> : vector<128xf32>
    %18 = vector.multi_reduction <add>, %17, %cst_8 [0] : vector<256x128xf32> to vector<128xf32>
    %19 = vector.shape_cast %18 : vector<128xf32> to vector<1x128xf32>
    %20 = arith.mulf %17, %17 : vector<256x128xf32>
    %cst_9 = arith.constant dense<0.000000e+00> : vector<128xf32>
    %21 = vector.multi_reduction <add>, %20, %cst_9 [0] : vector<256x128xf32> to vector<128xf32>
    %22 = vector.shape_cast %21 : vector<128xf32> to vector<1x128xf32>
    %cst_10 = arith.constant 0.000000e+00 : f32
    %23 = vector.broadcast %cst_10 : f32 to vector<6x128xf32>
    %24 = tpu.concatenate %19, %22, %23 in 0 : vector<1x128xf32>, vector<1x128xf32>, vector<6x128xf32> -> vector<8x128xf32>
    %25 = vector.shape_cast %24 : vector<8x128xf32> to vector<1x8x128xf32>
    %c0_11 = arith.constant 0 : index
    %c0_12 = arith.constant 0 : index
    %c0_13 = arith.constant 0 : index
    %26 = vector.load %arg5[%c0_11, %c0_12, %c0_13] : memref<1x8x128xf32, #tpu.memory_space<vmem>>, vector<1x8x128xf32>
    tpu.vector_store %arg5[%c0_11, %c0_12, %c0_13], %25 {strides = array<i32>} : memref<1x8x128xf32, #tpu.memory_space<vmem>>, vector<1x8x128xf32>,
    return
  }
  func.func @transform_0(%arg0: i32) -> (i32, i32) {
    %c0_i32 = arith.constant 0 : i32
    %c0_i32_0 = arith.constant 0 : i32
    return %arg0, %c0_i32 : i32, i32
  }
  func.func @transform_1(%arg0: i32) -> (i32, i32) {
    %c0_i32 = arith.constant 0 : i32
    %c0_i32_0 = arith.constant 0 : i32
    %c0_i32_1 = arith.constant 0 : i32
    return %c0_i32, %c0_i32_0 : i32, i32
  }
  func.func @transform_2(%arg0: i32) -> (i32, i32) {
    %c0_i32 = arith.constant 0 : i32
    %c0_i32_0 = arith.constant 0 : i32
    %c0_i32_1 = arith.constant 0 : i32
    return %c0_i32, %c0_i32_0 : i32, i32
  }
  func.func @transform_3(%arg0: i32) -> (i32, i32) {
    %c0_i32 = arith.constant 0 : i32
    %c0_i32_0 = arith.constant 0 : i32
    return %arg0, %c0_i32 : i32, i32
  }
  func.func @transform_4(%arg0: i32) -> (i32, i32, i32) {
    %c0_i32 = arith.constant 0 : i32
    %c0_i32_0 = arith.constant 0 : i32
    %c0_i32_1 = arith.constant 0 : i32
    return %arg0, %c0_i32, %c0_i32_0 : i32, i32, i32
  }
}

</mosaic_0001>

<bundles_post_ra>
// kernel: tpu_custom_call.1
= control target key start
LH: loop header
LB: loop body
LE: loop exit
PB: predicated region body
PF: predicated region fallthrough
CT: control target
= control target key end

     0   :  { %10 = vsyncpa [#allocation3], 0  ;;  %s2334_s0 = inlined_call_operand.hbm [shape: bf16[512,128], index: 0, kind: input, shape index: {}]   ;;  %s2335_s1 = inlined_call_operand.hbm [shape: bf16[128,128], index: 1, kind: input, shape index: {}]   ;;  %s2336_s2 = inlined_call_operand.vmem [shape: f32[1,128], index: 2, kind: input, shape index: {}]   ;;  %s2337_s3 = inlined_call_operand.hbm [shape: bf16[512,128], index: 3, kind: output, shape index: {0}]   ;;  %s2338_s4 = inlined_call_operand.hbm [shape: f32[2,8,128], index: 4, kind: output, shape index: {1}]  }
   0x1   :  { %12 = vsyncpa [#allocation3 + $0x1], 0 }
   0x2   :  { %13 = vsyncpa [#allocation6], 0 }
   0x3   :  { %14 = vsyncpa [#allocation4], 0 }
   0x4   :  { %16 = vsyncpa [#allocation4 + $0x1], 0 }
   0x5   :  { %17 = vsyncpa [#allocation9], 0 }
   0x6   :  { %19 = vsyncpa [#allocation9 + $0x1], 0  ;;  %s1797_s15 = smov 0   ;;  %s1799_s16 = smov 0  }
   0x7   :  { %s1801_s17 = smov 0   ;;  %s1803_s18 = smov 0  }
   0x8 LB: > { %s1818_s19 = sadd.s32 4294967295, %s1762_s18   ;;  %s1218_s20 = sadd.s32 4294967294, %s1762_s18   ;;  %s1762_s18 = sphi %s1803_s18, %s2358_s18   ;;  %s1758_s17 = sphi %s1801_s17, %s2357_s17   ;;  %s1754_s16 = sphi %s1799_s16, %s2356_s16   ;;  %s1750_s15 = sphi %s1797_s15, %s2355_s15  }
   0x9   : > { %p45_p0 = scmp.ne.s32.totalorder %s1754_s16, %s1750_s15  ;;  %p2339_p1 = scmp.eq.s32.totalorder %s1818_s19, 0 }
   0xa   : > { %p117_p3 = scmp.eq.s32.totalorder %s1218_s20, 1  ;;  %p1219_p5 = scmp.ge.s32.totalorder %s1762_s18, 1 }
   0xb   : > { %p1827_p4 = por %p2339_p1, %p45_p0  ;;  %p150_p7 = scmp.lt.s32.totalorder %s1762_s18, 3 }
   0xc   : > { %p1832_p6 = por %p117_p3, %p45_p0  ;;  %s1764_s24 = smov [#allocation5]  }
   0xd   : > { %s2342_s21 = scalar_select %p1827_p4, 1, 0 }
   0xe   : > { %s2343_s22 = scalar_select %p1832_p6, 1, 0 }
   0xf   : > { %p1837_p8 = pnand %p1219_p5, %p150_p7  ;;  %s162_s25 = sshll.u32 %s1764_s24, 4  ;;  %s1841_s25 = int_to_ptr.vmem [resolvable:$true] %s162_s25 }
  0x10   : > { %s1853_s27 = sadd.s32 1, %s1762_s18   ;;  %s32_s28 = sadd.s32 1, %s1758_s17 }
  0x11   : > { %s2344_s23 = scalar_select %p1837_p8, 1, 0 }
  0x12   : > { %p1522_p9 = pneg %p1837_p8  ;;  %s29_s29 = ssub.s32 %s1762_s18, %s1853_s27 }
  0x13   : > { %s1602_s6 = scalar_lea.hbm %s2335_s1, 1024 }
  0x14   : > { %p1848_p11 = pnand %p1522_p9, %p2339_p1  ;;  %p1603_p12 = scmp.ne.s32.totalorder %s2335_s1, %s1602_s6 }
  0x15   : > { %p1609_p5 = scmp.lt.u32.totalorder %s1602_s6, %s2335_s1 }
  0x16   : > { %p1604_p13 = pneg %p1848_p11 }
  0x18   : > { %p1605_p0 = pnand %p1604_p13, %p1603_p12 }
  0x1a   : > { %p1606_p3 = pneg %p1605_p0 }
  0x1c   : > { %p1611_p7 = pnand %p1609_p5, %p1606_p3 }
  0x1e   : > { %1614 = shalt.err (!%p1611_p7)
}
  0x1f   : > { %s1615_s11 = scalar_lea.vmem %s1841_s25, 1024  ;;  %p1623_p2 = scmp.lt.s32.totalorder %s1841_s25, %s1841_s25 }
  0x20   : > { %p1616_p9 = scmp.ne.s32.totalorder %s1841_s25, %s1615_s11  ;;  %p1624_p6 = scmp.lt.s32.totalorder %s1615_s11, %s1615_s11 }
  0x22   : > { %p1618_p10 = pnand %p1616_p9, %p1604_p13  ;;  %p1625_p4 = por %p1624_p6, %p1623_p2 }
  0x24   : > { %p1619_p1 = pneg %p1618_p10 }
  0x26   : > { %p1626_p8 = pnand %p1625_p4, %p1619_p1 }
  0x28   : > { %1629 = shalt.err (!%p1626_p8)
}
  0x29   : > { %s1765_s12 = smov 64   ;;  %s1766_s13 = smov 4  }
  0x2a   : > { %1525 = dma.hbm_to_vmem [thread:$0]  (!%p1848_p11), %s2335_s1, 1024, %s1841_s25, [#allocation6], %s1765_s12, %s1765_s12, %s1766_s13  }
  0x2b   : > { %p30_p1 = scmp.eq.s32.totalorder %s29_s29, 0  ;;  %p39_p2 = scmp.ne.s32.totalorder %s1758_s17, %s1754_s16 }
  0x2c   : > { %p40_p4 = scmp.eq.s32.totalorder %s1762_s18, 0  ;;  %p1538_p6 = scmp.lt.s32.totalorder %s1762_s18, 2 }
  0x2d   : > { %s1887_s24 = scalar_select %p30_p1, %s1758_s17, %s32_s28  }
  0x2e   : > { %p41_p8 = por %p40_p4, %p39_p2  ;;  %p2346_p10 = scmp.eq.s32.totalorder %s1818_s19, 1 }
  0x2f   : > { %s179_s26 = sand.u32 1, %s1758_s17   ;;  %s1295_s5 = sshll.u32 %s1762_s18, 11 }
  0x30   : > { %p1891_p12 = por %p2346_p10, %p39_p2  ;;  %s1222_s6 = sshll.u32 %s179_s26, 7 }
  0x31   : > { %s1900_s9 = scalar_lea.hbm %s2334_s0, %s1295_s5  ;;  %s183_s25 = scalar_lea.vmem [#allocation2], %s1222_s6 }
  0x32   : > { %s190_s28 = sshll.u32 %s183_s25, 4  ;;  %p1902_p11 = pnand %p1538_p6, %p41_p8  ;;  %s1906_s28 = int_to_ptr.vmem [resolvable:$true] %s190_s28 }
  0x33   : > { %s1908_s10 = scalar_lea.sflag [#allocation3], %s179_s26  ;;  %s1630_s11 = scalar_lea.hbm %s1900_s9, 2048 }
  0x34   : > { %p1631_p13 = scmp.ne.s32.totalorder %s1900_s9, %s1630_s11  ;;  %p1632_p0 = pneg %p1902_p11 }
  0x35   : > { %s1635_s5 = scalar_lea.hbm %s2334_s0, 4096  ;;  %p1636_p7 = scmp.lt.u32.totalorder %s1900_s9, %s2334_s0 }
  0x36   : > { %p1633_p3 = pnand %p1632_p0, %p1631_p13  ;;  %p1637_p9 = scmp.lt.u32.totalorder %s1635_s5, %s1630_s11 }
  0x37   : > { %p1639_p2 = scmp.lt.u32.totalorder %s1630_s11, %s1900_s9 }
  0x38   : > { %p1634_p5 = pneg %p1633_p3  ;;  %p1638_p1 = por %p1637_p9, %p1636_p7 }
  0x3a   : > { %p1640_p4 = por %p1639_p2, %p1638_p1 }
  0x3c   : > { %p1641_p6 = pnand %p1640_p4, %p1634_p5 }
  0x3e   : > { %1644 = shalt.err (!%p1641_p6)
}
  0x3f   : > { %s1645_s26 = scalar_lea.vmem %s1906_s28, 2048  ;;  %s1767_s8 = smov [#allocation2]  }
  0x40   : > { %p1646_p8 = scmp.ne.s32.totalorder %s1906_s28, %s1645_s26  ;;  %s1650_s25 = sshll.u32 %s1767_s8, 4  ;;  %s1651_s25 = int_to_ptr.vmem [resolvable:$false] %s1650_s25 }
  0x41   : > { %s1652_s14 = scalar_lea.vmem %s1651_s25, 4096  ;;  %p1653_p3 = scmp.lt.s32.totalorder %s1906_s28, %s1651_s25 }
  0x42   : > { %p1648_p10 = pnand %p1646_p8, %p1632_p0  ;;  %p1654_p7 = scmp.lt.s32.totalorder %s1652_s14, %s1645_s26 }
  0x44   : > { %p1649_p13 = pneg %p1648_p10  ;;  %p1655_p9 = por %p1654_p7, %p1653_p3 }
  0x46   : > { %p1656_p1 = pnand %p1655_p9, %p1649_p13 }
  0x48   : > { %1659 = shalt.err (!%p1656_p1)
}
  0x49   : > { %1529 = dma.hbm_to_vmem [thread:$0]  (!%p1902_p11), %s1900_s9, 2048, %s1906_s28, %s1908_s10, %s1765_s12, %s1765_s12, %s1766_s13  }
  0x4a   : > { %p2349_p0 = scmp.ne.s32.totalorder %s2344_s23, 0 }
  0x4b   : > { %s1942_s11 = sand.u32 (!%p2349_p0), 1, %s1754_s16   ;;  %p2350_p5 = scmp.ne.s32.totalorder (!%p2349_p0), %s2342_s21, 0 }
  0x4c   : > { %202 = sbr.rel (%p2349_p0) target bundleno = 442 (0x1ba), region = 32  ;;  %s1226_s20 = sshll.u32 (!%p2349_p0), %s1942_s11, 7 }
  0x4d   : > { %s205_s5 = scalar_lea.sflag (!%p2349_p0), [#allocation3], %s1942_s11  ;;  %s1948_s29 = scalar_lea.vmem (!%p2349_p0), [#allocation2], %s1226_s20 }
  0x53   : > { %1733 = dma.done.wait (%p2350_p5), %s205_s5, 2048  }
  0x54   : > { %1735 = vsyncadd (%p2350_p5), %s205_s5, 4294965248  ;;  %p2351_p11 = scmp.eq.s32.totalorder %s1818_s19, 0 }
  0x56   : > { %1737 = dma.done.wait (%p2351_p11), [#allocation6], 1024   ;;  %p2352_p2 = pmov %p2351_p11 }
  0x57   : > { %v1578_v0 = vld [vmem:[#allocation5] sm:$0xff]   ;;  %v1579_v1 = vld [vmem:[#allocation5 + $0x8] sm:$0xff]   ;;  %v1580_v2 = vld [vmem:[#allocation5 + $0x10] sm:$0xff]   ;;  %v765_v24 = vlaneseq  ;;  %s1287_s21 = sshll.u32 %s1818_s19, 8  ;;  %s2050_s13 = scalar_lea.vmem [#allocation7], %s1226_s20 }
  0x58   : > { %1739 = vsyncadd (%p2352_p2), [#allocation6], 4294966272  ;;  %1448 = vmatprep.subr.bf16.mxu0 %v1578_v0  ;;  %1496 = vmatprep.subr.bf16.mxu1 %v1578_v0  ;;  %v1581_v3 = vld [vmem:[#allocation5 + $0x18] sm:$0xff]   ;;  %v1586_v4 = vld [vmem:[%s1948_s29] sm:$0xff]   ;;  %v1979_v28 = vstv %s1287_s21  ;;  %s1328_s9 = sshll.u32 %s1818_s19, 11  ;;  %s1090_s28 = sshll.u32 %s2050_s13, 4  ;;  %s2212_s28 = int_to_ptr.vmem [resolvable:$true] %s1090_s28 }
  0x59   : > { %1449 = vmatpush3.bf16.msra.mxu0 %v1578_v0  ;;  %1504 = vmatpush3.bf16.msra.mxu1 %v1578_v0  ;;  %v1582_v5 = vld [vmem:[#allocation5 + $0x20] sm:$0xff]   ;;  %v1583_v6 = vld [vmem:[#allocation5 + $0x28] sm:$0xff]   ;;  %v1584_v8 = vld [vmem:[#allocation5 + $0x30] sm:$0xff]   ;;  %v1974_v25 = vshrl.u32 %v765_v24, 7  ;;  %s2210_s7 = scalar_lea.hbm %s2337_s3, %s1328_s9  ;;  %s1072_s26 = scalar_lea.sflag [#allocation4], %s1942_s11 }
  0x5a   : > { %1450 = vmatprep.subr.bf16.mxu0 %v1579_v1  ;;  %1497 = vmatprep.subr.bf16.mxu1 %v1579_v1  ;;  %v1594_v7 = vld [vmem:[%s1948_s29 + $0x40] sm:$0xff]   ;;  %v1585_v9 = vld [vmem:[#allocation5 + $0x38] sm:$0xff]   ;;  %v1587_v10 = vld [vmem:[%s1948_s29 + $0x8] sm:$0xff]   ;;  %s1660_s8 = scalar_lea.vmem %s2212_s28, 2048  ;;  %s1768_s25 = smov [#allocation7]  }
  0x5b   : > { %1464 = vmatprep.mubr.bf16.mxu0 %v1586_v4  ;;  %1480 = vmatprep.mubr.bf16.mxu1 %v1594_v7  ;;  %v1595_v11 = vld [vmem:[%s1948_s29 + $0x48] sm:$0xff]   ;;  %v1588_v12 = vld [vmem:[%s1948_s29 + $0x10] sm:$0xff]   ;;  %v1589_v14 = vld [vmem:[%s1948_s29 + $0x18] sm:$0xff]   ;;  %v768_v26 = vadd.s32 16, %v1974_v25  ;;  %v769_v27 = vadd.s32 24, %v1974_v25  ;;  %v767_v29 = vadd.s32 8, %v1974_v25  ;;  %v800_v34 = vadd.s32 %v1979_v28, %v1974_v25  ;;  %p1661_p4 = scmp.ne.s32.totalorder %s2212_s28, %s1660_s8 }
  0x5c   : > { %v1596_v13 = vld [vmem:[%s1948_s29 + $0x50] sm:$0xff]   ;;  %v1597_v15 = vld [vmem:[%s1948_s29 + $0x58] sm:$0xff]   ;;  %v1590_v16 = vld [vmem:[%s1948_s29 + $0x20] sm:$0xff]   ;;  %v770_v30 = vadd.s32 32, %v1974_v25  ;;  %v772_v31 = vadd.s32 48, %v1974_v25  ;;  %v771_v32 = vadd.s32 40, %v1974_v25 }
  0x5d   : > { %1451 = vmatpush3.bf16.msra.mxu0 %v1579_v1  ;;  %1505 = vmatpush3.bf16.msra.mxu1 %v1579_v1  ;;  %v1598_v17 = vld [vmem:[%s1948_s29 + $0x60] sm:$0xff]   ;;  %v1591_v18 = vld [vmem:[%s1948_s29 + $0x28] sm:$0xff]   ;;  %v1592_v20 = vld [vmem:[%s1948_s29 + $0x30] sm:$0xff]   ;;  %v802_v33 = vadd.s32 %v1979_v28, %v768_v26  ;;  %v803_v35 = vadd.s32 %v1979_v28, %v769_v27  ;;  %v801_v36 = vadd.s32 %v1979_v28, %v767_v29  ;;  %v773_v38 = vadd.s32 56, %v1974_v25  ;;  %p1662_p6 = pnand %p1661_p4, %p1891_p12  ;;  %s1664_s14 = sshll.u32 %s1768_s25, 4  ;;  %s1665_s14 = int_to_ptr.vmem [resolvable:$false] %s1664_s14 }
  0x5e   : > { %1452 = vmatprep.subr.bf16.mxu0 %v1580_v2  ;;  %1498 = vmatprep.subr.bf16.mxu1 %v1580_v2  ;;  %v1599_v19 = vld [vmem:[%s1948_s29 + $0x68] sm:$0xff]   ;;  %v1600_v21 = vld [vmem:[%s1948_s29 + $0x70] sm:$0xff]   ;;  %v1593_v22 = vld [vmem:[%s1948_s29 + $0x38] sm:$0xff]   ;;  %v1991_v37 = vadd.s32 %v1979_v28, %v770_v30  ;;  %v776_v39 = vadd.s32 80, %v1974_v25  ;;  %v774_v40 = vadd.s32 64, %v1974_v25  ;;  %v2002_v42 = vadd.s32 %v1979_v28, %v772_v31  ;;  %s1666_s20 = scalar_lea.vmem %s1665_s14, 4096  ;;  %p1667_p10 = scmp.lt.s32.totalorder %s2212_s28, %s1665_s14 }
  0x5f   : > { %v1601_v23 = vld [vmem:[%s1948_s29 + $0x78] sm:$0xff]   ;;  %v1999_v41 = vld [vmem:[%s2336_s2] ss:$0 sm:$0xff]  ;;  %v2005_v43 = vadd.s32 %v1979_v28, %v771_v32  ;;  %v777_v44 = vadd.s32 88, %v1974_v25  ;;  %vm834_vm0 = vcmp.lt.s32.totalorder %v802_v33, 512  ;;  %vm832_vm1 = vcmp.lt.s32.totalorder %v800_v34, 512  ;;  %p1663_p8 = pneg %p1662_p6  ;;  %p1668_p13 = scmp.lt.s32.totalorder %s1666_s20, %s1660_s8 }
  0x60   : > { %vm835_vm2 = vcmp.lt.s32.totalorder %v803_v35, 512  ;;  %vm833_vm3 = vcmp.lt.s32.totalorder %v801_v36, 512  ;;  %vm836_vm4 = vcmp.lt.s32.totalorder %v1991_v37, 512  ;;  %v2010_v48 = vadd.s32 %v1979_v28, %v773_v38 }
  0x61   : > { %1453 = vmatpush3.bf16.msra.mxu0 %v1580_v2  ;;  %1506 = vmatpush3.bf16.msra.mxu1 %v1580_v2  ;;  %v775_v49 = vadd.s32 72, %v1974_v25  ;;  %v2016_v54 = vadd.s32 %v1979_v28, %v776_v39  ;;  %v2019_v55 = vadd.s32 %v1979_v28, %v774_v40  ;;  %vm838_vm5 = vcmp.lt.s32.totalorder %v2002_v42, 512  ;;  %p1669_p3 = por %p1668_p13, %p1667_p10 }
  0x62   : > { %1454 = vmatprep.subr.bf16.mxu0 %v1581_v3  ;;  %1499 = vmatprep.subr.bf16.mxu1 %v1581_v3  ;;  %vm837_vm6 = vcmp.lt.s32.totalorder %v2005_v43, 512  ;;  %v2025_v59 = vadd.s32 %v1979_v28, %v777_v44  ;;  %v780_v1 = vadd.s32 112, %v1974_v25  ;;  %v778_v2 = vadd.s32 96, %v1974_v25 }
  0x63   : > { %vm839_vm7 = vcmp.lt.s32.totalorder %v2010_v48, 512  ;;  %v2039_v4 = vadd.s32 %v1979_v28, %v775_v49  ;;  %vm840_vm8 = vcmp.lt.s32.totalorder %v2019_v55, 512  ;;  %vm842_vm9 = vcmp.lt.s32.totalorder %v2016_v54, 512  ;;  %p1670_p7 = pnand %p1669_p3, %p1663_p8 }
  0x64   : > { %vm843_vm11 = vcmp.lt.s32.totalorder %v2025_v59, 512  ;;  %v783_v42 = vadd.s32 136, %v1974_v25  ;;  %v785_v48 = vadd.s32 152, %v1974_v25 }
  0x65   : > { %1455 = vmatpush3.bf16.msra.mxu0 %v1581_v3  ;;  %1507 = vmatpush3.bf16.msra.mxu1 %v1581_v3  ;;  %vm841_vm10 = vcmp.lt.s32.totalorder %v2039_v4, 512 }
  0x66   : > { %1456 = vmatprep.subr.bf16.mxu0 %v1582_v5  ;;  %1500 = vmatprep.subr.bf16.mxu1 %v1582_v5 }
  0x69   : > { %1457 = vmatpush3.bf16.msra.mxu0 %v1582_v5  ;;  %1508 = vmatpush3.bf16.msra.mxu1 %v1582_v5  ;;  %v781_v5 = vadd.s32 120, %v1974_v25 }
  0x6a   : > { %1458 = vmatprep.subr.bf16.mxu0 %v1583_v6  ;;  %1501 = vmatprep.subr.bf16.mxu1 %v1583_v6 }
  0x6b   : > { %v2068_v26 = vadd.s32 %v1979_v28, %v781_v5 }
  0x6d   : > { %1459 = vmatpush3.bf16.msra.mxu0 %v1583_v6  ;;  %1509 = vmatpush3.bf16.msra.mxu1 %v1583_v6  ;;  %v779_v6 = vadd.s32 104, %v1974_v25  ;;  %vm847_vm15 = vcmp.lt.s32.totalorder %v2068_v26, 512  ;;  %v789_v26 = vadd.s32 184, %v1974_v25 }
  0x6e   : > { %1460 = vmatprep.subr.bf16.mxu0 %v1584_v8  ;;  %1502 = vmatprep.subr.bf16.mxu1 %v1584_v8 }
  0x6f   : > { %v2074_v32 = vadd.s32 %v1979_v28, %v779_v6 }
  0x71   : > { %1461 = vmatpush3.bf16.msra.mxu0 %v1584_v8  ;;  %1510 = vmatpush3.bf16.msra.mxu1 %v1584_v8  ;;  %vm845_vm14 = vcmp.lt.s32.totalorder %v2074_v32, 512 }
  0x72   : > { %1462 = vmatprep.subr.bf16.mxu0 %v1585_v9  ;;  %1503 = vmatprep.subr.bf16.mxu1 %v1585_v9 }
  0x75   : > { %1463 = vmatpush3.bf16.msra.mxu0 %v1585_v9  ;;  %1511 = vmatpush3.bf16.msra.mxu1 %v1585_v9 }
  0x78   : > { %1465 = vmatmul.mubr.bf16.vlgmr.msra.gmra.mrb[0].mxu0 %v1587_v10  ;;  %1481 = vmatmul.mubr.bf16.vlgmr.msra.gmra.mrb[0].mxu1 %v1595_v11 }
  0x79   : > { %1468 = vmatprep.mubr.bf16.mxu0 %v1588_v12  ;;  %1484 = vmatprep.mubr.bf16.mxu1 %v1596_v13 }
  0x80   : > { %1469 = vmatmul.mubr.bf16.gmra.mrb[4].mxu0 %v1589_v14  ;;  %1485 = vmatmul.mubr.bf16.gmra.mrb[4].mxu1 %v1597_v15 }
  0x81   : > { %1472 = vmatprep.mubr.bf16.mxu0 %v1590_v16  ;;  %1488 = vmatprep.mubr.bf16.mxu1 %v1598_v17  ;;  %v2058_v17 = vadd.s32 %v1979_v28, %v780_v1  ;;  %v782_v1 = vadd.s32 128, %v1974_v25 }
  0x83   : > { %vm846_vm13 = vcmp.lt.s32.totalorder %v2058_v17, 512 }
  0x88   : > { %1473 = vmatmul.mubr.bf16.gmra.mrb[8].mxu0 %v1591_v18  ;;  %1489 = vmatmul.mubr.bf16.gmra.mrb[8].mxu1 %v1599_v19  ;;  %v2061_v18 = vadd.s32 %v1979_v28, %v778_v2 }
  0x89   : > { %1476 = vmatprep.mubr.bf16.mxu0 %v1592_v20  ;;  %1492 = vmatprep.mubr.bf16.mxu1 %v1600_v21 }
  0x8a   : > { %vm844_vm12 = vcmp.lt.s32.totalorder %v2061_v18, 512 }
  0x90   : > { %1477 = vmatmul.mubr.bf16.gmra.mrb[12].mxu0 %v1593_v22  ;;  %1493 = vmatmul.mubr.bf16.gmra.mrb[12].mxu1 %v1601_v23 }
 0x14b   : > { %v1466_v45 = vpop.f32.mrb[0].mxu0  ;;  %v1482_v46 = vpop.f32.mrb[0].mxu1 }
 0x14c   : > { %v478_v47 = vpop.f32.mrb[1].mxu0  ;;  %v542_v50 = vpop.f32.mrb[1].mxu1  ;;  %v487_v51 = vadd.f32 %v1466_v45, %v1999_v41  ;;  %v2028_v60 = vadd.f32 %v1482_v46, %v1999_v41 }
 0x14d   : > { %v479_v52 = vadd.f32 %v1999_v41, %v478_v47  ;;  %v1467_v53 = vpop.f32.mrb[2].mxu0  ;;  %v1483_v56 = vpop.f32.mrb[2].mxu1  ;;  %v2046_v10 = vadd.f32 %v1999_v41, %v542_v50  ;;  %v784_v47 = vadd.s32 144, %v1974_v25 }
 0x14e   : > { %v490_v57 = vadd.f32 %v1467_v53, %v1999_v41  ;;  %v481_v58 = vpop.f32.mrb[3].mxu0  ;;  %v2031_v61 = vadd.f32 %v1483_v56, %v1999_v41  ;;  %v545_v62 = vpop.f32.mrb[3].mxu1  ;;  %v930_v7 = vsel %vm834_vm0, %v487_v51, 0.0 }
 0x14f   : > { %v928_v63 = vsel %vm832_vm1, %v479_v52, 0.0  ;;  %v482_v0 = vadd.f32 %v1999_v41, %v481_v58  ;;  %v2064_v19 = vadd.f32 %v1999_v41, %v545_v62  ;;  %v999_v21 = vmul.f32 %v930_v7, %v930_v7 }
 0x150   : > { %v1337_v3 = vpack.c.bf16 %v490_v57, %v487_v51  ;;  %v997_v11 = vmul.f32 %v928_v63, %v928_v63  ;;  %v1377_v14 = vpack.c.bf16 %v2031_v61, %v2028_v60  ;;  %v931_v15 = vsel %vm835_vm2, %v490_v57, 0.0 }
 0x151   : > { %v1332_v8 = vpack.c.bf16 %v482_v0, %v479_v52  ;;  %v929_v9 = vsel %vm833_vm3, %v482_v0, 0.0  ;;  %v1372_v33 = vpack.c.bf16 %v2064_v19, %v2046_v10  ;;  %v1000_v35 = vmul.f32 %v931_v15, %v931_v15 }
 0x152   : > { %1409 = vst [vmem:[%s2050_s13 + $0x8] sm:$0xff] %v1337_v3   ;;  %v960_v12 = vadd.f32 %v929_v9, %v928_v63  ;;  %v998_v13 = vmul.f32 %v929_v9, %v929_v9  ;;  %1417 = vst [vmem:[%s2050_s13 + $0x48] sm:$0xff] %v1377_v14  }
 0x153   : > { %1333 = vst [vmem:[%s2050_s13] sm:$0xff] %v1332_v8   ;;  %v1470_v16 = vpop.f32.mrb[4].mxu0  ;;  %v1486_v20 = vpop.f32.mrb[4].mxu1  ;;  %1416 = vst [vmem:[%s2050_s13 + $0x40] sm:$0xff] %v1372_v33  }
 0x154   : > { %v961_v22 = vadd.f32 %v960_v12, %v930_v7  ;;  %v1029_v23 = vadd.f32 %v998_v13, %v997_v11  ;;  %v494_v24 = vpop.f32.mrb[5].mxu0  ;;  %v558_v27 = vpop.f32.mrb[5].mxu1  ;;  %v503_v29 = vadd.f32 %v1470_v16, %v1999_v41  ;;  %v2087_v49 = vadd.f32 %v1486_v20, %v1999_v41 }
 0x155   : > { %v495_v30 = vadd.f32 %v1999_v41, %v494_v24  ;;  %v1471_v31 = vpop.f32.mrb[6].mxu0  ;;  %v1487_v34 = vpop.f32.mrb[6].mxu1  ;;  %v2095_v58 = vadd.f32 %v1999_v41, %v558_v27 }
 0x156   : > { %v1030_v36 = vadd.f32 %v1029_v23, %v999_v21  ;;  %v962_v38 = vadd.f32 %v961_v22, %v931_v15  ;;  %v506_v39 = vadd.f32 %v1471_v31, %v1999_v41  ;;  %v497_v40 = vpop.f32.mrb[7].mxu0  ;;  %v561_v44 = vpop.f32.mrb[7].mxu1  ;;  %v934_v37 = vsel %vm838_vm5, %v503_v29, 0.0 }
 0x157   : > { %v932_v45 = vsel %vm836_vm4, %v495_v30, 0.0  ;;  %v498_v46 = vadd.f32 %v1999_v41, %v497_v40  ;;  %v2104_v5 = vadd.f32 %v1487_v34, %v1999_v41  ;;  %v2107_v43 = vadd.f32 %v1999_v41, %v561_v44 }
 0x158   : > { %v963_v50 = vadd.f32 %v962_v38, %v932_v45  ;;  %v1001_v51 = vmul.f32 %v932_v45, %v932_v45  ;;  %v1031_v52 = vadd.f32 %v1030_v36, %v1000_v35  ;;  %v1347_v53 = vpack.c.bf16 %v506_v39, %v503_v29 }
 0x159   : > { %v1342_v56 = vpack.c.bf16 %v498_v46, %v495_v30  ;;  %v933_v57 = vsel %vm837_vm6, %v498_v46, 0.0  ;;  %v935_v2 = vsel %vm839_vm7, %v506_v39, 0.0  ;;  %v1003_v7 = vmul.f32 %v934_v37, %v934_v37 }
 0x15a   : > { %v1032_v62 = vadd.f32 %v1031_v52, %v1001_v51  ;;  %1411 = vst [vmem:[%s2050_s13 + $0x18] sm:$0xff] %v1347_v53   ;;  %v964_v63 = vadd.f32 %v963_v50, %v933_v57  ;;  %v1002_v0 = vmul.f32 %v933_v57, %v933_v57  ;;  %v1387_v16 = vpack.c.bf16 %v2104_v5, %v2087_v49 }
 0x15b   : > { %1410 = vst [vmem:[%s2050_s13 + $0x10] sm:$0xff] %v1342_v56   ;;  %v1474_v3 = vpop.f32.mrb[8].mxu0  ;;  %v1490_v6 = vpop.f32.mrb[8].mxu1  ;;  %v1382_v20 = vpack.c.bf16 %v2107_v43, %v2095_v58  ;;  %v1004_v22 = vmul.f32 %v935_v2, %v935_v2  ;;  %v2126_v34 = vadd.s32 %v1979_v28, %v782_v1  ;;  %v2129_v35 = vadd.s32 %v1979_v28, %v783_v42 }
 0x15c   : > { %v965_v8 = vadd.f32 %v964_v63, %v934_v37  ;;  %v1033_v9 = vadd.f32 %v1032_v62, %v1002_v0  ;;  %v510_v11 = vpop.f32.mrb[9].mxu0  ;;  %v2111_v12 = vpop.f32.mrb[9].mxu1  ;;  %v519_v13 = vadd.f32 %v1474_v3, %v1999_v41  ;;  %1419 = vst [vmem:[%s2050_s13 + $0x58] sm:$0xff] %v1387_v16   ;;  %v2139_v46 = vadd.s32 %v1979_v28, %v784_v47 }
 0x15d   : > { %v511_v14 = vadd.f32 %v1999_v41, %v510_v11  ;;  %v1475_v15 = vpop.f32.mrb[10].mxu0  ;;  %v1491_v21 = vpop.f32.mrb[10].mxu1  ;;  %1418 = vst [vmem:[%s2050_s13 + $0x50] sm:$0xff] %v1382_v20   ;;  %v2143_v53 = vadd.s32 %v1979_v28, %v785_v48  ;;  %vm848_vm0 = vcmp.lt.s32.totalorder %v2126_v34, 512  ;;  %v2150_v4 = vadd.f32 %v1490_v6, %v1999_v41 }
 0x15e   : > { %v1034_v23 = vadd.f32 %v1033_v9, %v1003_v7  ;;  %v966_v24 = vadd.f32 %v965_v8, %v935_v2  ;;  %v522_v27 = vadd.f32 %v1475_v15, %v1999_v41  ;;  %v513_v29 = vpop.f32.mrb[11].mxu0  ;;  %v577_v30 = vpop.f32.mrb[11].mxu1  ;;  %v938_v55 = vsel %vm842_vm9, %v519_v13, 0.0 }
 0x15f   : > { %v936_v31 = vsel %vm840_vm8, %v511_v14, 0.0  ;;  %v514_v33 = vadd.f32 %v1999_v41, %v513_v29  ;;  %v2153_v47 = vadd.f32 %v1491_v21, %v1999_v41  ;;  %v1007_v57 = vmul.f32 %v938_v55, %v938_v55 }
 0x160   : > { %v967_v36 = vadd.f32 %v966_v24, %v936_v31  ;;  %v1005_v38 = vmul.f32 %v936_v31, %v936_v31  ;;  %v1035_v39 = vadd.f32 %v1034_v23, %v1004_v22  ;;  %v1357_v40 = vpack.c.bf16 %v522_v27, %v519_v13 }
 0x161   : > { %v1352_v44 = vpack.c.bf16 %v514_v33, %v511_v14  ;;  %v937_v45 = vsel %vm841_vm10, %v514_v33, 0.0  ;;  %v939_v37 = vsel %vm843_vm11, %v522_v27, 0.0  ;;  %vm849_vm1 = vcmp.lt.s32.totalorder %v2129_v35, 512 }
 0x162   : > { %v1036_v50 = vadd.f32 %v1035_v39, %v1005_v38  ;;  %1413 = vst [vmem:[%s2050_s13 + $0x28] sm:$0xff] %v1357_v40   ;;  %v968_v51 = vadd.f32 %v967_v36, %v937_v45  ;;  %v1006_v52 = vmul.f32 %v937_v45, %v937_v45  ;;  %v786_v42 = vadd.s32 160, %v1974_v25 }
 0x163   : > { %1412 = vst [vmem:[%s2050_s13 + $0x20] sm:$0xff] %v1352_v44   ;;  %v1478_v54 = vpop.f32.mrb[12].mxu0  ;;  %v1494_v56 = vpop.f32.mrb[12].mxu1  ;;  %v1397_v6 = vpack.c.bf16 %v2153_v47, %v2150_v4  ;;  %v1008_v8 = vmul.f32 %v939_v37, %v939_v37  ;;  %vm850_vm2 = vcmp.lt.s32.totalorder %v2139_v46, 512  ;;  %v2168_v20 = vadd.f32 %v1999_v41, %v2111_v12 }
 0x164   : > { %v969_v62 = vadd.f32 %v968_v51, %v938_v55  ;;  %v1037_v63 = vadd.f32 %v1036_v50, %v1006_v52  ;;  %v526_v0 = vpop.f32.mrb[13].mxu0  ;;  %v590_v1 = vpop.f32.mrb[13].mxu1  ;;  %v535_v59 = vadd.f32 %v1478_v54, %v1999_v41  ;;  %v2172_v21 = vadd.f32 %v1999_v41, %v577_v30 }
 0x165   : > { %v527_v2 = vadd.f32 %v1999_v41, %v526_v0  ;;  %v1479_v3 = vpop.f32.mrb[14].mxu0  ;;  %v1495_v7 = vpop.f32.mrb[14].mxu1  ;;  %1421 = vst [vmem:[%s2050_s13 + $0x68] sm:$0xff] %v1397_v6   ;;  %vm851_vm3 = vcmp.lt.s32.totalorder %v2143_v53, 512  ;;  %v788_v31 = vadd.s32 176, %v1974_v25  ;;  %v787_v38 = vadd.s32 168, %v1974_v25 }
 0x166   : > { %v1038_v9 = vadd.f32 %v1037_v63, %v1007_v57  ;;  %v970_v11 = vadd.f32 %v969_v62, %v939_v37  ;;  %v538_v48 = vadd.f32 %v1479_v3, %v1999_v41  ;;  %v529_v13 = vpop.f32.mrb[15].mxu0  ;;  %v593_v14 = vpop.f32.mrb[15].mxu1  ;;  %v942_v18 = vsel %vm846_vm13, %v535_v59, 0.0 }
 0x167   : > { %v940_v15 = vsel %vm844_vm12, %v527_v2, 0.0  ;;  %v530_v16 = vadd.f32 %v1999_v41, %v529_v13  ;;  %v944_v17 = vsel %vm848_vm0, %v2046_v10, 0.0  ;;  %v1392_v32 = vpack.c.bf16 %v2172_v21, %v2168_v20 }
 0x168   : > { %v971_v22 = vadd.f32 %v970_v11, %v940_v15  ;;  %v1009_v23 = vmul.f32 %v940_v15, %v940_v15  ;;  %v1039_v24 = vadd.f32 %v1038_v9, %v1008_v8  ;;  %v1367_v27 = vpack.c.bf16 %v538_v48, %v535_v59 }
 0x169   : > { %v1362_v29 = vpack.c.bf16 %v530_v16, %v527_v2  ;;  %v941_v12 = vsel %vm845_vm14, %v530_v16, 0.0  ;;  %v943_v39 = vsel %vm847_vm15, %v538_v48, 0.0  ;;  %v2191_v40 = vadd.f32 %v1494_v56, %v1999_v41  ;;  %1420 = vst [vmem:[%s2050_s13 + $0x60] sm:$0xff] %v1392_v32  }
 0x16a   : > { %v1040_v30 = vadd.f32 %v1039_v24, %v1009_v23  ;;  %1415 = vst [vmem:[%s2050_s13 + $0x38] sm:$0xff] %v1367_v27   ;;  %v972_v33 = vadd.f32 %v971_v22, %v941_v12  ;;  %v1010_v36 = vmul.f32 %v941_v12, %v941_v12  ;;  %v1011_v55 = vmul.f32 %v942_v18, %v942_v18 }
 0x16b   : > { %1414 = vst [vmem:[%s2050_s13 + $0x30] sm:$0xff] %v1362_v29   ;;  %v820_v50 = vadd.s32 %v1979_v28, %v786_v42  ;;  %v2199_v51 = vadd.f32 %v1999_v41, %v590_v1  ;;  %v2202_v10 = vadd.f32 %v1495_v7, %v1999_v41  ;;  %v2205_v34 = vadd.f32 %v1999_v41, %v593_v14 }
 0x16c   : > { %v973_v44 = vadd.f32 %v972_v33, %v942_v18  ;;  %v1041_v45 = vadd.f32 %v1040_v30, %v1010_v36  ;;  %v1012_v52 = vmul.f32 %v943_v39, %v943_v39  ;;  %v1013_v56 = vmul.f32 %v944_v17, %v944_v17 }
 0x16d   : > { %v945_v57 = vsel %vm849_vm1, %v2064_v19, 0.0  ;;  %v821_v41 = vadd.s32 %v1979_v28, %v787_v38  ;;  %v1407_v62 = vpack.c.bf16 %v2202_v10, %v2191_v40  ;;  %v1402_v63 = vpack.c.bf16 %v2205_v34, %v2199_v51 }
 0x16e   : > { %v1042_v37 = vadd.f32 %v1041_v45, %v1011_v55  ;;  %v974_v54 = vadd.f32 %v973_v44, %v943_v39  ;;  %vm852_vm4 = vcmp.lt.s32.totalorder %v820_v50, 512  ;;  %v790_v59 = vadd.s32 192, %v1974_v25 }
 0x16f   : > { %v946_v19 = vsel %vm850_vm2, %v2028_v60, 0.0  ;;  %v822_v35 = vadd.s32 %v1979_v28, %v788_v31  ;;  %1423 = vst [vmem:[%s2050_s13 + $0x78] sm:$0xff] %v1407_v62   ;;  %1422 = vst [vmem:[%s2050_s13 + $0x70] sm:$0xff] %v1402_v63   ;;  %v1014_v42 = vmul.f32 %v945_v57, %v945_v57  ;;  %v823_v6 = vadd.s32 %v1979_v28, %v789_v26 }
 0x170   : > { %v975_v0 = vadd.f32 %v974_v54, %v944_v17  ;;  %v1043_v1 = vadd.f32 %v1042_v37, %v1012_v52 }
 0x172   : > { %v1044_v2 = vadd.f32 %v1043_v1, %v1013_v56  ;;  %v976_v3 = vadd.f32 %v975_v0, %v945_v57 }
 0x173   : > { %1673 = shalt.err (!%p1670_p7)
}
 0x174   : > { %s1674_s5 = scalar_lea.hbm %s2210_s7, 2048  ;;  %s1678_s23 = scalar_lea.hbm %s2337_s3, 4096 }
 0x175   : > { %p1675_p9 = scmp.ne.s32.totalorder %s2210_s7, %s1674_s5  ;;  %p1679_p5 = scmp.lt.u32.totalorder %s2210_s7, %s2337_s3 }
 0x176   : > { %p1680_p11 = scmp.lt.u32.totalorder %s1678_s23, %s1674_s5  ;;  %p1682_p4 = scmp.lt.u32.totalorder %s1674_s5, %s2210_s7 }
 0x177   : > { %p1676_p1 = pnand %p1675_p9, %p1891_p12 }
 0x178   : > { %p1681_p2 = por %p1680_p11, %p1679_p5 }
 0x179   : > { %p1677_p0 = pneg %p1676_p1 }
 0x17a   : > { %p1683_p6 = por %p1682_p4, %p1681_p2 }
 0x17c   : > { %p1684_p8 = pnand %p1683_p6, %p1677_p0 }
 0x17e   : > { %1687 = shalt.err (!%p1684_p8)
}
 0x17f   : > { %s1769_s9 = smov 64   ;;  %s1770_s10 = smov 4   ;;  %v947_v60 = vsel %vm851_vm3, %v2031_v61, 0.0  ;;  %v948_v46 = vsel %vm852_vm4, %v2095_v58, 0.0  ;;  %vm853_vm5 = vcmp.lt.s32.totalorder %v821_v41, 512  ;;  %v791_v7 = vadd.s32 200, %v1974_v25 }
 0x180   : > { %1518 = dma.vmem_to_hbm [thread:$0]  (%p1891_p12), %s2212_s28, 2048, %s2210_s7, %s1072_s26, %s1769_s9, %s1769_s9, %s1770_s10   ;;  %v1015_v8 = vmul.f32 %v946_v19, %v946_v19  ;;  %v977_v9 = vadd.f32 %v976_v3, %v946_v19  ;;  %v1045_v11 = vadd.f32 %v1044_v2, %v1014_v42  ;;  %v824_v48 = vadd.s32 %v1979_v28, %v790_v59 }
 0x181   : > { %vm854_vm6 = vcmp.lt.s32.totalorder %v822_v35, 512  ;;  %v792_v13 = vadd.s32 208, %v1974_v25  ;;  %v793_v14 = vadd.s32 216, %v1974_v25  ;;  %v1016_v15 = vmul.f32 %v947_v60, %v947_v60  ;;  %s1229_s28 = sshll.u32 %s1942_s11, 3  ;;  %s1292_s6 = sshll.u32 %s1818_s19, 7 }
 0x182   : > { %v1046_v16 = vadd.f32 %v1045_v11, %v1015_v8  ;;  %v978_v53 = vadd.f32 %v977_v9, %v947_v60  ;;  %v1017_v61 = vmul.f32 %v948_v46, %v948_v46  ;;  %vm855_vm7 = vcmp.lt.s32.totalorder %v823_v6, 512  ;;  %s241_s7 = scalar_lea.vmem [#allocation8], %s1229_s28  ;;  %s2290_s14 = scalar_lea.hbm %s2338_s4, %s1292_s6 }
 0x183   : > { %v949_v58 = vsel %vm853_vm5, %v2107_v43, 0.0  ;;  %v825_v22 = vadd.s32 %v1979_v28, %v791_v7  ;;  %vm856_vm8 = vcmp.lt.s32.totalorder %v824_v48, 512  ;;  %v794_v27 = vadd.s32 224, %v1974_v25  ;;  %s1106_s26 = sshll.u32 %s241_s7, 4  ;;  %s1077_s20 = scalar_lea.sflag [#allocation9], %s1942_s11  ;;  %s2292_s26 = int_to_ptr.vmem [resolvable:$true] %s1106_s26 }
 0x184   : > { %v979_v23 = vadd.f32 %v978_v53, %v948_v46  ;;  %v1047_v24 = vadd.f32 %v1046_v16, %v1016_v15  ;;  %v950_v18 = vsel %vm854_vm6, %v2087_v49, 0.0  ;;  %v826_v29 = vadd.s32 %v1979_v28, %v792_v13  ;;  %s1688_s19 = scalar_lea.vmem %s2292_s26, 128  ;;  %s1771_s5 = smov [#allocation8]  }
 0x185   : > { %v1018_v30 = vmul.f32 %v949_v58, %v949_v58  ;;  %v827_v33 = vadd.s32 %v1979_v28, %v793_v14  ;;  %v951_v36 = vsel %vm855_vm7, %v2104_v5, 0.0  ;;  %v952_v43 = vsel %vm856_vm8, %v2168_v20, 0.0  ;;  %p1689_p10 = scmp.ne.s32.totalorder %s2292_s26, %s1688_s19  ;;  %s1692_s29 = sshll.u32 %s1771_s5, 4  ;;  %s1693_s29 = int_to_ptr.vmem [resolvable:$false] %s1692_s29 }
 0x186   : > { %v1048_v12 = vadd.f32 %v1047_v24, %v1017_v61  ;;  %v980_v31 = vadd.f32 %v979_v23, %v949_v58  ;;  %vm857_vm9 = vcmp.lt.s32.totalorder %v825_v22, 512  ;;  %v795_v38 = vadd.s32 232, %v1974_v25  ;;  %s1694_s21 = scalar_lea.vmem %s1693_s29, 256  ;;  %p1695_p7 = scmp.lt.s32.totalorder %s2292_s26, %s1693_s29 }
 0x187   : > { %v1019_v39 = vmul.f32 %v950_v18, %v950_v18  ;;  %v828_v55 = vadd.s32 %v1979_v28, %v794_v27  ;;  %vm858_vm10 = vcmp.lt.s32.totalorder %v826_v29, 512  ;;  %v796_v49 = vadd.s32 240, %v1974_v25  ;;  %p1690_p13 = pnand %p1689_p10, %p1891_p12  ;;  %p1696_p9 = scmp.lt.s32.totalorder %s1694_s21, %s1688_s19 }
 0x188   : > { %v981_v17 = vadd.f32 %v980_v31, %v950_v18  ;;  %v1049_v32 = vadd.f32 %v1048_v12, %v1018_v30  ;;  %v1020_v44 = vmul.f32 %v951_v36, %v951_v36  ;;  %v1021_v26 = vmul.f32 %v952_v43, %v952_v43 }
 0x189   : > { %vm859_vm11 = vcmp.lt.s32.totalorder %v827_v33, 512  ;;  %v953_v5 = vsel %vm857_vm9, %v2172_v21, 0.0  ;;  %v797_v20 = vadd.s32 248, %v1974_v25  ;;  %vm860_vm12 = vcmp.lt.s32.totalorder %v828_v55, 512  ;;  %p1691_p3 = pneg %p1690_p13  ;;  %p1697_p1 = por %p1696_p9, %p1695_p7 }
 0x18a   : > { %v1050_v45 = vadd.f32 %v1049_v32, %v1019_v39  ;;  %v982_v50 = vadd.f32 %v981_v17, %v951_v36  ;;  %v829_v54 = vadd.s32 %v1979_v28, %v795_v38  ;;  %v954_v56 = vsel %vm858_vm10, %v2150_v4, 0.0 }
 0x18b   : > { %v830_v57 = vadd.s32 %v1979_v28, %v796_v49  ;;  %v1022_v63 = vmul.f32 %v953_v5, %v953_v5  ;;  %v955_v0 = vsel %vm859_vm11, %v2153_v47, 0.0  ;;  %v956_v1 = vsel %vm860_vm12, %v2199_v51, 0.0  ;;  %p1698_p0 = pnand %p1697_p1, %p1691_p3 }
 0x18c   : > { %v983_v52 = vadd.f32 %v982_v50, %v952_v43  ;;  %v1051_v37 = vadd.f32 %v1050_v45, %v1020_v44  ;;  %v831_v21 = vadd.s32 %v1979_v28, %v797_v20  ;;  %v1023_v59 = vmul.f32 %v954_v56, %v954_v56 }
 0x18d   : > { %vm861_vm13 = vcmp.lt.s32.totalorder %v829_v54, 512  ;;  %vm862_vm14 = vcmp.lt.s32.totalorder %v830_v57, 512  ;;  %v1024_v35 = vmul.f32 %v955_v0, %v955_v0  ;;  %v1025_v4 = vmul.f32 %v956_v1, %v956_v1 }
 0x18e   : > { %v1052_v41 = vadd.f32 %v1051_v37, %v1021_v26  ;;  %v984_v62 = vadd.f32 %v983_v52, %v953_v5  ;;  %v957_v42 = vsel %vm861_vm13, %v2205_v34, 0.0  ;;  %vm863_vm15 = vcmp.lt.s32.totalorder %v831_v21, 512 }
 0x18f   : > { %v958_v47 = vsel %vm862_vm14, %v2191_v40, 0.0  ;;  %v1026_v28 = vmul.f32 %v957_v42, %v957_v42  ;;  %v959_v7 = vsel %vm863_vm15, %v2202_v10, 0.0  ;;  %vm1066_vm0 = vcmask 1040384  }
 0x190   : > { %v985_v25 = vadd.f32 %v984_v62, %v954_v56  ;;  %v1053_v19 = vadd.f32 %v1052_v41, %v1022_v63  ;;  %v1027_v8 = vmul.f32 %v958_v47, %v958_v47  ;;  %v1028_v48 = vmul.f32 %v959_v7, %v959_v7 }
 0x191   : > { %vm1068_vm1 = vcmask 1041408  }
 0x192   : > { %v1054_v2 = vadd.f32 %v1053_v19, %v1023_v59  ;;  %v986_v3 = vadd.f32 %v985_v25, %v955_v0 }
 0x194   : > { %v987_v6 = vadd.f32 %v986_v3, %v956_v1  ;;  %v1055_v60 = vadd.f32 %v1054_v2, %v1024_v35 }
 0x196   : > { %v1056_v46 = vadd.f32 %v1055_v60, %v1025_v4  ;;  %v988_v51 = vadd.f32 %v987_v6, %v957_v42 }
 0x198   : > { %v989_v9 = vadd.f32 %v988_v51, %v958_v47  ;;  %v1057_v11 = vadd.f32 %v1056_v46, %v1026_v28 }
 0x19a   : > { %v990_v13 = vadd.f32 %v989_v9, %v959_v7  ;;  %v1058_v14 = vadd.f32 %v1057_v11, %v1027_v8 }
 0x19c   : > { %v991_v15 = vrot.slane %v990_v13, 4  ;;  %v1059_v34 = vadd.f32 %v1058_v14, %v1028_v48 }
 0x19e   : > { %v992_v16 = vadd.f32 %v991_v15, %v990_v13  ;;  %v1060_v53 = vrot.slane %v1059_v34, 4 }
 0x1a0   : > { %v993_v61 = vrot.slane %v992_v16, 2  ;;  %v1061_v58 = vadd.f32 %v1060_v53, %v1059_v34 }
 0x1a2   : > { %v994_v40 = vadd.f32 %v993_v61, %v992_v16  ;;  %v1062_v22 = vrot.slane %v1061_v58, 2 }
 0x1a4   : > { %v995_v23 = vrot.slane %v994_v40, 1  ;;  %v1063_v24 = vadd.f32 %v1062_v22, %v1061_v58 }
 0x1a6   : > { %v1064_v10 = vrot.slane %v1063_v24, 1  ;;  %v996_v27 = vadd.f32 %v995_v23, %v994_v40 }
 0x1a8   : > { %v1065_v18 = vadd.f32 %v1064_v10, %v1063_v24 }
 0x1aa   : > { %v1067_v29 = vsel %vm1066_vm0, %v996_v27, %v1065_v18 }
 0x1ab   : > { %v1069_v12 = vsel %vm1068_vm1, %v1067_v29, 0.0 }
 0x1ac   : > { %1070 = vst [vmem:[%s241_s7] sm:$0xff] %v1069_v12 }
 0x1ad   : > { %1701 = shalt.err (!%p1698_p0)
}
 0x1ae   : > { %s1702_s11 = scalar_lea.hbm %s2290_s14, 128  ;;  %s1706_s13 = scalar_lea.hbm %s2338_s4, 256 }
 0x1af   : > { %p1703_p5 = scmp.ne.s32.totalorder %s2290_s14, %s1702_s11  ;;  %p1707_p4 = scmp.lt.u32.totalorder %s2290_s14, %s2338_s4 }
 0x1b0   : > { %p1708_p6 = scmp.lt.u32.totalorder %s1706_s13, %s1702_s11  ;;  %p1710_p10 = scmp.lt.u32.totalorder %s1702_s11, %s2290_s14 }
 0x1b1   : > { %p1704_p11 = pnand %p1703_p5, %p1891_p12 }
 0x1b2   : > { %p1709_p8 = por %p1708_p6, %p1707_p4 }
 0x1b3   : > { %p1705_p2 = pneg %p1704_p11 }
 0x1b4   : > { %p1711_p13 = por %p1710_p10, %p1709_p8 }
 0x1b6   : > { %p1712_p3 = pnand %p1711_p13, %p1705_p2 }
 0x1b8   : > { %1715 = shalt.err (!%p1712_p3)
}
 0x1b9   : > { %1519 = dma.vmem_to_hbm [thread:$0]  (%p1891_p12), %s2292_s26, 128, %s2290_s14, %s1077_s20  }
 0x1ba PF: > { %s1118_s28 = sand.u32 1, %s1750_s15   ;;  %p2353_p7 = scmp.ne.s32.totalorder %s2343_s22, 0 }
 0x1bb   : > { %p2354_p9 = scmp.ge.s32.totalorder %s1762_s18, 2  ;;  %s1119_s6 = scalar_lea.sflag [#allocation4], %s1118_s28 }
 0x1bd   : > { %p1531_p1 = pnand %p2354_p9, %p2353_p7 }
 0x1bf   : > { %1741 = dma.done.wait (!%p1531_p1), %s1119_s6, 2048  }
 0x1c0   : > { %1743 = vsyncadd (!%p1531_p1), %s1119_s6, 4294965248  ;;  %s1128_s7 = scalar_lea.sflag [#allocation9], %s1118_s28 }
 0x1c1   : > { %1745 = dma.done.wait (!%p1531_p1), %s1128_s7, 128  }
 0x1c2   : > { %1747 = vsyncadd (!%p1531_p1), %s1128_s7, 4294967168  ;;  %p22_p12 = scmp.ge.s32.totalorder %s1853_s27, 4   ;;  %s2355_s15 = smov %s1754_s16 }
 0x1c3   : > { %s2356_s16 = smov %s1758_s17  ;;  %s2357_s17 = smov %s1887_s24 }
 0x1c4   : > { %s2358_s18 = smov %s1853_s27  ;;  %24 = sbr.rel (!%p22_p12) target bundleno = 8 (0x8), region = 98 }
 0x1cb   :  { %1133 = vsyncpa [#allocation3], 1 }
 0x1cc   :  { %1135 = vsyncpa [#allocation3 + $0x1], 1 }
 0x1cd   :  { %1136 = vsyncpa [#allocation6], 1 }
 0x1ce   :  { %1137 = vsyncpa [#allocation4], 1 }
 0x1cf   :  { %1139 = vsyncpa [#allocation4 + $0x1], 1 }
 0x1d0   :  { %1140 = vsyncpa [#allocation9], 1 }
 0x1d1   :  { %1142 = vsyncpa [#allocation9 + $0x1], 1 }

</bundles_post_ra>
